<compile_context>
chip_gen: v7x
topology: tpu7x:2x2x1
jax: 0.10.0
libtpu: 0.0.40
codegen_flags: <defaults>
</compile_context>

<pallas_src>
import math

import jax
import jax.numpy as jnp
from jax.experimental import pallas as pl
from jax.experimental.pallas import tpu as pltpu


# ----------------------------- kernels --------------------------------------


def _repeat_kernel_2d(x_ref, o_ref):
    """Output tile (TB, W) <- W//in_w side-by-side copies of the resident input tile."""
    x = x_ref[...]
    in_w = x_ref.shape[1]
    reps = o_ref.shape[1] // in_w            # static, bounded (<= 512)
    for r in range(reps):
        o_ref[:, r * in_w:(r + 1) * in_w] = x


def _repeat_kernel_3d(x_ref, o_ref):
    """Output tile (TB, R, P) <- R copies of the resident (TB, P) input tile.

    When R % 8 == 0 the copies are stored in 8-sublane groups (full-vreg stores)."""
    x = x_ref[...]
    tb, reps, p = o_ref.shape
    g = 8 if reps % 8 == 0 else 1            # static store group
    xg = jnp.broadcast_to(x[:, None, :], (tb, g, p))
    for r in range(0, reps, g):
        o_ref[:, r:r + g, :] = xg


# --------------------------- pallas wrappers ---------------------------------


def _repeat_to_3d(signal: jax.Array, n_rep: int, *, out_block_bytes: int) -> jax.Array:
    """(B, P) -> (B, n_rep, P) with out[b, r, :] == signal[b, :]."""
    B, P = signal.shape
    dt = signal.dtype
    isz = int(dt.itemsize)

    if n_rep <= 8:
        R = n_rep                                         # == full dim (legal block)
    else:
        R = 8 * max(1, min(n_rep // 8, out_block_bytes // (8 * P * isz), 64))
    TB = max(1, min(B, out_block_bytes // (R * P * isz)))

    grid = (pl.cdiv(B, TB), pl.cdiv(n_rep, R))
    return pl.pallas_call(
        _repeat_kernel_3d,
        out_shape=jax.ShapeDtypeStruct((B, n_rep, P), dt),
        grid=grid,
        in_specs=[pl.BlockSpec((TB, P), lambda i, j: (i, 0))],
        out_specs=pl.BlockSpec((TB, R, P), lambda i, j: (i, j, 0)),
        compiler_params=pltpu.CompilerParams(
            dimension_semantics=("parallel", "parallel")),
        cost_estimate=pl.CostEstimate(
            flops=0, transcendentals=0,
            bytes_accessed=(B * P + B * n_rep * P) * isz),
    )(signal)


def loop_trunk_transformation(signal: jax.Array, duration_ms: int, sample_rate: int,
                              *, out_block_bytes: int = 1 << 20,
                              in_block_bytes: int = 1 << 20) -> jax.Array:
    """Pallas implementation of LoopTrunkTransformation.forward."""
    # NOTE: matches the PyTorch module's rounding exactly (float division, then int()).
    max_len = int(sample_rate / 1000 * duration_ms)
    B, L = signal.shape

    # Truncate-only (or empty target): pure XLA slice, already at HBM roofline.
    if max_len <= 0 or L >= max_len:
        return signal[:, :max_len]
    if L == 0:
        raise ValueError("signal with 0 samples cannot be looped to a positive length")

    dt = signal.dtype
    isz = int(dt.itemsize)
    period = L
    n_rep = -(-max_len // period)            # ceil(max_len / period), >= 2 here

    # ---- unaligned period: make it lane-aligned with a cheap "super-period" ----
    if period % 128 != 0:
        k = 128 // math.gcd(period, 128)
        super_p = k * period
        if super_p * 4 <= max_len and B * super_p * isz <= (32 << 20):
            # one tiny XLA tile (<= 25% extra traffic) -> aligned fast path below
            signal = jnp.tile(signal, (1, k))
            period = super_p
            n_rep = -(-max_len // period)
        else:
            # few repeats needed: 3-D repeat kernel, free reshape (+ tail slice).
            min_blk = (n_rep if n_rep <= 8 else 8) * period * isz
            if min_blk > (8 << 20):
                # TODO(synk): huge unaligned looping period - chunked masked Pallas
                # path not implemented; extreme corner handled in plain XLA.
                return jnp.tile(signal, (1, n_rep))[:, :max_len]
            out3 = _repeat_to_3d(signal, n_rep, out_block_bytes=out_block_bytes)
            out = out3.reshape(B, n_rep * period)
            return out if n_rep * period == max_len else out[:, :max_len]

    # ---- aligned looping path (period % 128 == 0) ----
    TB = B if B <= 8 else 8
    lanes_in = max(128, (in_block_bytes // (TB * isz)) // 128 * 128)
    lanes_out = max(128, (out_block_bytes // (TB * isz)) // 128 * 128)

    # Small batch + exact repeat count: put repeats in the sublane slot so every
    # store is a full vreg, and the final reshape to (B, max_len) is free.
    if (B < 8 and max_len % period == 0 and n_rep >= 8
            and 8 * period * isz <= out_block_bytes):
        out3 = _repeat_to_3d(signal, n_rep, out_block_bytes=out_block_bytes)
        return out3.reshape(B, max_len)

    if period <= lanes_in:
        # whole period resident in VMEM; output tile packs as many repeats as the
        # byte budget allows (no artificial repeat cap).
        in_w = period
        nck = 1
        R = max(1, min(lanes_out // period, 512, n_rep))
        if R >= n_rep and n_rep >= 2:
            R = -(-n_rep // 2)               # keep >=2 streaming blocks (pipelining / v7x)
        W = R * period
    else:
        # long period: stream it in 128-aligned chunks that divide the period,
        # so blocks never blow past the VMEM budget.
        m = period // 128
        d_max = max(1, min(m, lanes_in // 128, lanes_out // 128))
        d = 1
        for cand in range(d_max, 0, -1):
            if m % cand == 0:
                d = cand
                break
        in_w = 128 * d
        nck = period // in_w
        W = in_w

    if nck == 1:
        in_map = lambda i, t: (i, 0)                     # input resident across t
    else:
        in_map = lambda i, t: (i, t % nck)               # cycle through period chunks

    grid = (pl.cdiv(B, TB), pl.cdiv(max_len, W))
    return pl.pallas_call(
        _repeat_kernel_2d,
        out_shape=jax.ShapeDtypeStruct((B, max_len), dt),
        grid=grid,
        in_specs=[pl.BlockSpec((TB, in_w), in_map)],
        out_specs=pl.BlockSpec((TB, W), lambda i, t: (i, t)),
        compiler_params=pltpu.CompilerParams(
            dimension_semantics=("parallel", "parallel")),
        cost_estimate=pl.CostEstimate(
            flops=0, transcendentals=0,
            bytes_accessed=(B * period + B * max_len) * isz),
    )(signal)


# ------------------------------ reference ------------------------------------


def _reference(signal: jax.Array, duration_ms: int, sample_rate: int) -> jax.Array:
    """Pure-JAX transcription of the PyTorch forward (for verification)."""
    max_len = int(sample_rate / 1000 * duration_ms)
    sig = signal
    while sig.shape[1] < max_len:
        sig = jnp.concatenate([sig, sig], axis=1)
    return sig[:, :max_len]


def _check(name, out, exp):
    assert out.shape == exp.shape, (name, out.shape, exp.shape)
    assert out.dtype == exp.dtype, (name, out.dtype, exp.dtype)
    assert bool(jnp.all(out == exp)), f"mismatch vs reference: {name}"


if __name__ == "__main__":
    key = jax.random.PRNGKey(0)
    k1, k2, k3, k4, k5 = jax.random.split(key, 5)

    # 1) Aligned looping path with a ragged output tail (period%128==0, max_len%period!=0).
    sig = jax.random.normal(k1, (2, 384), dtype=jnp.float32)          # max_len = 1024
    out = jax.block_until_ready(loop_trunk_transformation(sig, 64, 16000))
    _check("aligned ragged tail", out, _reference(sig, 64, 16000))

    # 2) Small-batch sublane-dense 3-D route (max_len % period == 0, n_rep >= 8).
    sig2 = jax.random.normal(k2, (2, 128), dtype=jnp.float32)         # max_len = 2048
    out2 = jax.block_until_ready(loop_trunk_transformation(sig2, 128, 16000))
    _check("B<8 sublane-dense", out2, _reference(sig2, 128, 16000))

    # 3) Truncate-only bypass (L >= max_len): pure slice, no kernel.
    sig3 = jax.random.normal(k3, (2, 2048), dtype=jnp.float32)        # max_len = 1024
    out3 = jax.block_until_ready(loop_trunk_transformation(sig3, 64, 16000))
    _check("truncate bypass", out3, _reference(sig3, 64, 16000))

    # 4) Unaligned period, long target -> super-period + aligned fast path.
    sig4 = jax.random.normal(k4, (2, 100), dtype=jnp.float32)         # max_len = 16000
    out4 = jax.block_until_ready(loop_trunk_transformation(sig4, 1000, 16000))
    _check("super-period", out4, _reference(sig4, 1000, 16000))

    # 5) Unaligned period, short target -> 3-D fallback kernel (+ tail slice).
    out5 = jax.block_until_ready(loop_trunk_transformation(sig4, 37, 22050))
    _check("3-D fallback", out5, _reference(sig4, 37, 22050))

    # 6) Long aligned period with tiny byte budgets -> chunked-period streaming path.
    sig6 = jax.random.normal(k5, (2, 1024), dtype=jnp.float32)        # max_len = 2688
    out6 = jax.block_until_ready(loop_trunk_transformation(
        sig6, 168, 16000, out_block_bytes=4096, in_block_bytes=4096))
    _check("chunked period", out6, _reference(sig6, 168, 16000))

    # 7) Batch > 8 (TB = 8, full sublanes) on the aligned path.
    sig7 = jax.random.normal(k1, (16, 256), dtype=jnp.float32)        # max_len = 1536
    out7 = jax.block_until_ready(loop_trunk_transformation(sig7, 96, 16000))
    _check("batch tiles", out7, _reference(sig7, 96, 16000))

    print("KERNEL_OK")
</pallas_src>

<mosaic_0001>
module attributes {stable_mosaic.version = 11 : i64} {
  func.func @_repeat_kernel_2d(%arg0: i32, %arg1: i32, %arg2: memref<2x384xf32, #tpu.memory_space<vmem>>, %arg3: memref<2x768xf32, #tpu.memory_space<vmem>>) attributes {dimension_semantics = [#tpu.dimension_semantics<parallel>, #tpu.dimension_semantics<parallel>], iteration_bounds = array<i64: 1, 2>, scalar_prefetch = 0 : i64, scratch_operands = 0 : i64, tpu.core_type = #tpu.core_type<tc>, window_params = [{transform_indices = @transform_0, window_bounds = array<i64: 2, 384>}, {transform_indices = @transform_1, window_bounds = array<i64: 2, 768>}]} {
    %c0 = arith.constant 0 : index
    %c0_0 = arith.constant 0 : index
    %0 = vector.load %arg2[%c0, %c0_0] : memref<2x384xf32, #tpu.memory_space<vmem>>, vector<2x384xf32>
    %c0_1 = arith.constant 0 : index
    %c0_2 = arith.constant 0 : index
    %1 = vector.load %arg3[%c0_1, %c0_2] : memref<2x768xf32, #tpu.memory_space<vmem>>, vector<2x384xf32>
    tpu.vector_store %arg3[%c0_1, %c0_2], %0 {strides = array<i32>} : memref<2x768xf32, #tpu.memory_space<vmem>>, vector<2x384xf32>,
    %c0_3 = arith.constant 0 : index
    %c384 = arith.constant 384 : index
    %2 = vector.load %arg3[%c0_3, %c384] : memref<2x768xf32, #tpu.memory_space<vmem>>, vector<2x384xf32>
    tpu.vector_store %arg3[%c0_3, %c384], %0 {strides = array<i32>} : memref<2x768xf32, #tpu.memory_space<vmem>>, vector<2x384xf32>,
    return
  }
  func.func @transform_0(%arg0: i32, %arg1: i32) -> (i32, i32) {
    %c0_i32 = arith.constant 0 : i32
    %c0_i32_0 = arith.constant 0 : i32
    return %arg0, %c0_i32 : i32, i32
  }
  func.func @transform_1(%arg0: i32, %arg1: i32) -> (i32, i32) {
    %c0_i32 = arith.constant 0 : i32
    return %arg0, %arg1 : i32, i32
  }
}

</mosaic_0001>

<bundles_post_ra>
// kernel: tpu_custom_call.1
= control target key start
LH: loop header
LB: loop body
LE: loop exit
PB: predicated region body
PF: predicated region fallthrough
CT: control target
= control target key end

     0   :  { %6 = vsyncpa [#allocation3], 0  ;;  %s590_s0 = inlined_call_operand.hbm [shape: f32[2,384], index: 0, kind: input, shape index: {}]   ;;  %s591_s1 = inlined_call_operand.hbm [shape: f32[2,1024], index: 1, kind: output, shape index: {}]  }
   0x1   :  { %7 = vsyncpa [#allocation4], 0 }
   0x2   :  { %9 = vsyncpa [#allocation4 + $0x1], 0  ;;  %s437_s6 = smov 0   ;;  %s439_s7 = smov 0  }
   0x3   :  { %s441_s8 = smov 0   ;;  %s443_s9 = smov 0  }
   0x4   :  { %s445_s10 = smov 0   ;;  %s447_s11 = smov 0  }
   0x5 LB: > { %s233_s12 = sadd.s32 4294967295, %s423_s11   ;;  %s234_s13 = sadd.s32 4294967294, %s423_s11   ;;  %s423_s11 = sphi %s447_s11, %s15_s11   ;;  %s419_s10 = sphi %s445_s10, %s608_s10   ;;  %s415_s9 = sphi %s443_s9, %s607_s9   ;;  %s411_s8 = sphi %s441_s8, %s606_s8   ;;  %s407_s7 = sphi %s439_s7, %s605_s7   ;;  %s403_s6 = sphi %s437_s6, %s604_s6  }
   0x6   : > { %s24_s14 = sadd.s32 1, %s419_s10  ;;  %s62_s15 = sadd.s32 1, %s411_s8 }
   0x7   : > { %p25_p0 = scmp.ge.s32.totalorder %s24_s14, 2  ;;  %p72_p1 = scmp.ne.s32.totalorder %s411_s8, %s407_s7 }
   0x8   : > { %p73_p2 = scmp.eq.s32.totalorder %s233_s12, 1  ;;  %p78_p3 = scmp.ne.s32.totalorder %s407_s7, %s403_s6 }
   0x9   : > { %s610_s14 = smov (%p25_p0, %s24_s14), 0  ;;  %p79_p5 = scmp.eq.s32.totalorder %s234_s13, 1 }
   0xa   : > { %p477_p4 = por %p73_p2, %p72_p1  ;;  %s58_s17 = ssub.s32 %s419_s10, %s610_s14 }
   0xb   : > { %p235_p6 = scmp.ge.s32.totalorder %s423_s11, 1  ;;  %p60_p7 = scmp.eq.s32.totalorder %s58_s17, 0 }
   0xc   : > { %s595_s16 = scalar_select %p477_p4, 1, 0 }
   0xd   : > { %p484_p8 = por %p79_p5, %p78_p3  ;;  %p86_p9 = scmp.lt.s32.totalorder %s423_s11, 3 }
   0xe   : > { %s490_s19 = scalar_select %p60_p7, %s411_s8, %s62_s15  }
   0xf   : > { %s596_s18 = scalar_select %p484_p8, 1, 0 }
  0x10   : > { %p492_p10 = pnand %p235_p6, %p86_p9  ;;  %p496_p11 = scmp.eq.s32.totalorder %s233_s12, 0 }
  0x11   : > { %s425_s22 = smov [#allocation2]   ;;  %s313_s27 = scalar_lea.hbm %s590_s0, 96 }
  0x12   : > { %s597_s20 = scalar_select %p492_p10, 1, 0 }
  0x13   : > { %s598_s21 = scalar_select %p496_p11, 1, 0 }
  0x14   : > { %p253_p12 = pneg %p492_p10  ;;  %s102_s23 = sshll.u32 %s425_s22, 4  ;;  %s103_s23 = int_to_ptr.vmem [resolvable:$true] %s102_s23 }
  0x15   : > { %p314_p0 = scmp.ne.s32.totalorder %s590_s0, %s313_s27  ;;  %p320_p5 = scmp.lt.u32.totalorder %s313_s27, %s590_s0 }
  0x16   : > { %p504_p13 = pnand %p496_p11, %p253_p12 }
  0x18   : > { %p315_p1 = pneg %p504_p13 }
  0x1a   : > { %p316_p2 = pnand %p315_p1, %p314_p0 }
  0x1c   : > { %p317_p3 = pneg %p316_p2 }
  0x1e   : > { %p322_p6 = pnand %p320_p5, %p317_p3 }
  0x20   : > { %325 = shalt.err (!%p322_p6)
}
  0x21   : > { %s326_s3 = scalar_lea.vmem %s103_s23, 96  ;;  %p334_p8 = scmp.lt.s32.totalorder %s103_s23, %s103_s23 }
  0x22   : > { %p327_p7 = scmp.ne.s32.totalorder %s103_s23, %s326_s3  ;;  %p335_p4 = scmp.lt.s32.totalorder %s326_s3, %s326_s3 }
  0x24   : > { %p329_p9 = pnand %p327_p7, %p315_p1  ;;  %p336_p11 = por %p335_p4, %p334_p8 }
  0x26   : > { %p330_p12 = pneg %p329_p9 }
  0x28   : > { %p337_p10 = pnand %p336_p11, %p330_p12 }
  0x2a   : > { %340 = shalt.err (!%p337_p10)
}
  0x2b   : > { %256 = dma.hbm_to_vmem [thread:$0]  (!%p504_p13), %s590_s0, 96, %s103_s23, [#allocation3]  }
  0x2c   : > { %p600_p0 = scmp.ne.s32.totalorder %s597_s20, 0 }
  0x2d   : > { %p601_p2 = scmp.ne.s32.totalorder (!%p600_p0), %s598_s21, 0 }
  0x2e   : > { %115 = sbr.rel (%p600_p0) target bundleno = 90 (0x5a), region = 24 }
  0x35   : > { %394 = dma.done.wait (%p601_p2), [#allocation3], 96  }
  0x36   : > { %396 = vsyncadd (%p601_p2), [#allocation3], 4294967200  ;;  %s127_s12 = sand.u32 1, %s407_s7   ;;  %v135_v0 = vld [vmem:[#allocation2] sm:$0x3f]  ;;  %p602_p4 = scmp.ne.s32.totalorder %s595_s16, 0 }
  0x37   : > { %s247_s13 = smul.u32 12, %s127_s12  ;;  %s531_s17 = scalar_lea.sflag [#allocation4], %s127_s12 }
  0x38   : > { %145 = sbr.rel (!%p602_p4) target bundleno = 90 (0x5a), region = 32 }
  0x39   : > { %s129_s15 = scalar_lea.vmem [#allocation5], %s247_s13  ;;  %s146_s20 = smul.u32 (%p602_p4), 6, %s415_s9 }
  0x3a   : > { %136 = vst [vmem:[%s129_s15] sm:$0x3f] %v135_v0  ;;  %137 = vst [vmem:[%s129_s15 + $0x6] sm:$0x3f] %v135_v0 }
  0x3b   : > { %s147_s22 = ssub.s32 (%p602_p4), 8, %s146_s20 }
  0x3c   : > { %p148_p8 = scmp.lt.s32.totalorder (%p602_p4), %s147_s22, 6 }
  0x3f   : > { %s612_s22 = smov (!%p148_p8, %s147_s22), 6 }
  0x40   : > { %s536_s21 = sshll.u32 %s612_s22, 5 }
  0x41   : > { %s152_s23 = ssub.s32 192, %s536_s21 }
  0x42   : > { %153 = vsyncadd %s531_s17, %s152_s23  ;;  %p240_p10 = scmp.ne.s32.totalorder %s536_s21, 0  ;;  %s246_s24 = smul.u32 192, %s415_s9 }
  0x43   : > { %s161_s25 = sshll.u32 %s129_s15, 4  ;;  %s426_s29 = smov [#allocation5]   ;;  %s162_s25 = int_to_ptr.vmem [resolvable:$true] %s161_s25 }
  0x44   : > { %s545_s27 = scalar_lea.hbm %s591_s1, %s246_s24  ;;  %s341_s28 = scalar_lea.vmem %s162_s25, %s536_s21 }
  0x45   : > { %p342_p11 = scmp.ne.s32.totalorder %s162_s25, %s341_s28  ;;  %s345_s30 = sshll.u32 %s426_s29, 4  ;;  %s346_s30 = int_to_ptr.vmem [resolvable:$false] %s345_s30 }
  0x46   : > { %s347_s2 = scalar_lea.vmem %s346_s30, 384  ;;  %p348_p3 = scmp.lt.s32.totalorder %s162_s25, %s346_s30 }
  0x47   : > { %p343_p13 = pnand %p342_p11, %p240_p10  ;;  %p349_p5 = scmp.lt.s32.totalorder %s347_s2, %s341_s28 }
  0x49   : > { %p344_p1 = pneg %p343_p13  ;;  %p350_p6 = por %p349_p5, %p348_p3 }
  0x4b   : > { %p351_p7 = pnand %p350_p6, %p344_p1 }
  0x4d   : > { %354 = shalt.err (!%p351_p7)
}
  0x4e   : > { %s355_s9 = scalar_lea.hbm %s545_s27, %s536_s21  ;;  %s359_s5 = scalar_lea.hbm %s591_s1, 256 }
  0x4f   : > { %p356_p9 = scmp.ne.s32.totalorder %s545_s27, %s355_s9  ;;  %p360_p2 = scmp.lt.u32.totalorder %s545_s27, %s591_s1 }
  0x50   : > { %p361_p4 = scmp.lt.u32.totalorder %s359_s5, %s355_s9  ;;  %p363_p11 = scmp.lt.u32.totalorder %s355_s9, %s545_s27 }
  0x51   : > { %p357_p12 = pnand %p356_p9, %p240_p10 }
  0x52   : > { %p362_p8 = por %p361_p4, %p360_p2 }
  0x53   : > { %p358_p0 = pneg %p357_p12 }
  0x54   : > { %p364_p13 = por %p363_p11, %p362_p8 }
  0x56   : > { %p365_p1 = pnand %p364_p13, %p358_p0 }
  0x58   : > { %368 = shalt.err (!%p365_p1)
}
  0x59   : > { %164 = dma.vmem_to_hbm [thread:$0]  (%p240_p10), %s162_s25, %s536_s21, %s545_s27, %s531_s17  }
  0x5a PF: > { %p263_p3 = scmp.ge.s32.totalorder %s423_s11, 2  ;;  %s173_s15 = sand.u32 1, %s403_s6  }
  0x5b   : > { %p603_p5 = scmp.ne.s32.totalorder %s596_s18, 0  ;;  %s174_s20 = scalar_lea.sflag [#allocation4], %s173_s15 }
  0x5d   : > { %p258_p6 = pnand %p263_p3, %p603_p5 }
  0x5f   : > { %398 = dma.done.wait (!%p258_p6), %s174_s20, 192  }
  0x60   : > { %400 = vsyncadd (!%p258_p6), %s174_s20, 4294967104  ;;  %s15_s11 = sadd.s32 1, %s423_s11   ;;  %s604_s6 = smov %s407_s7 }
  0x61   : > { %p12_p7 = scmp.ge.s32.totalorder %s15_s11, 4   ;;  %s605_s7 = smov %s411_s8 }
  0x62   : > { %s606_s8 = smov %s490_s19  ;;  %s607_s9 = smov %s419_s10 }
  0x63   : > { %s608_s10 = smov %s610_s14  ;;  %14 = sbr.rel (!%p12_p7) target bundleno = 5 (0x5), region = 62 }
  0x6a   :  { %179 = vsyncpa [#allocation3], 1 }
  0x6b   :  { %181 = vsyncpa [#allocation3 + $0x1], 1 }
  0x6c   :  { %182 = vsyncpa [#allocation4], 1 }
  0x6d   :  { %184 = vsyncpa [#allocation4 + $0x1], 1 }

</bundles_post_ra>
